<compile_context>
chip_gen: v7x
topology: tpu7x:2x2x1
jax: 0.10.0
libtpu: 0.0.40
codegen_flags: <defaults>
</compile_context>

<pallas_src>
import jax
import jax.numpy as jnp
from jax.experimental import pallas as pl
from jax.experimental.pallas import tpu as pltpu

_LANE = 128
_SUB = 16                              # hidden-dim padding (bf16-friendly sublane multiple)
_TILE_B_MAX = 32768                    # hard cap on rows per grid step
_VMEM_DATA_BUDGET = 24 * 1024 * 1024   # budget for streamed buffers (leaves headroom)
_VMEM_LIMIT = 40 * 1024 * 1024         # <= v7x 64 MiB physical VMEM


def _squeeze(x: jnp.ndarray) -> jnp.ndarray:
    """JAX equivalent of torch.atleast_2d(X.squeeze())."""
    return jnp.atleast_2d(jnp.squeeze(x))


def _round_up(n: int, m: int) -> int:
    return ((n + m - 1) // m) * m


def _logpi_kernel(x_ref, w1t_ref, b1_ref, w2_ref, b2_ref, out_ref):
    # Layer 1, batch-on-lanes:  h = tanh(W1^T-form contracted with X over D)
    #   w1t: (H_pad, D)  x: (tile_b, D)  ->  h: (H_pad, tile_b) f32
    # X stays in its native dtype on the MXU (bf16 path when X is bf16);
    # accumulation is f32 via preferred_element_type.
    h = jnp.tanh(
        jax.lax.dot_general(
            w1t_ref[...], x_ref[...],
            dimension_numbers=(((1,), (1,)), ((), ())),
            preferred_element_type=jnp.float32,
        )
        + b1_ref[...]                                   # (H_pad, 1) broadcast over lanes
    )
    # Layer 2: plain (1, H_pad) @ (H_pad, tile_b) matmul -> already lane-dense (1, tile_b).
    z = jnp.dot(w2_ref[...], h, preferred_element_type=jnp.float32) + b2_ref[0]
    # Numerically stable log_sigmoid(z) = min(z, 0) - log1p(exp(-|z|))
    out_ref[...] = (jnp.minimum(z, 0.0) - jnp.log1p(jnp.exp(-jnp.abs(z)))).astype(out_ref.dtype)


def _pick_tile_b(B: int, D: int, x_itemsize: int, h_pad: int) -> int:
    """D-aware tile size: double-buffered lane-padded X tile + f32 hidden per row."""
    lane_d = _round_up(D, _LANE)                         # X is lane-padded to 128 in VMEM
    bytes_per_row = 2 * lane_d * x_itemsize + h_pad * 4 + 2 * 4
    tile = int(_VMEM_DATA_BUDGET // bytes_per_row)
    tile = (tile // _LANE) * _LANE
    return max(_LANE, min(tile, _TILE_B_MAX, _round_up(B, _LANE)))


def logpi_classifier_acquisition(x, w1, b1, w2, b2, *, tile_b=None):
    """Forward pass of LogPIClassiferAcquisition (synthetic MLP classifier)."""
    x2 = _squeeze(x)
    if x2.dtype not in (jnp.float32, jnp.bfloat16):
        x2 = x2.astype(jnp.float32)
    B, D = x2.shape
    H = w1.shape[1]
    h_pad = _round_up(H, _SUB)

    f32 = jnp.float32
    # Tiny resident weights.  Layer-1 weights match X's dtype so the MXU runs the
    # native (bf16 when available) path; biases / layer-2 stay f32.
    w1t = jnp.zeros((h_pad, D), x2.dtype).at[:H, :].set(w1.astype(x2.dtype).T)
    b1c = jnp.zeros((h_pad, 1), f32).at[:H, 0].set(b1.astype(f32).reshape(-1))
    w2r = jnp.zeros((1, h_pad), f32).at[0, :H].set(w2.astype(f32).reshape(-1))
    b2s = b2.astype(f32).reshape(-1)[:1]                  # (1,) scalar -> SMEM

    if tile_b is None:
        tile_b = _pick_tile_b(B, D, x2.dtype.itemsize, h_pad)
    tile_b = max(_LANE, _round_up(tile_b, _LANE))
    num_tiles = pl.cdiv(B, tile_b)   # ragged tail handled by Pallas boundary masking

    out = pl.pallas_call(
        _logpi_kernel,
        out_shape=jax.ShapeDtypeStruct((1, B), jnp.float32),
        grid_spec=pl.GridSpec(
            grid=(num_tiles,),
            in_specs=[
                pl.BlockSpec((tile_b, D), lambda i: (i, 0)),        # X: streamed batch tiles
                pl.BlockSpec((h_pad, D), lambda i: (0, 0)),         # W1^T: resident
                pl.BlockSpec((h_pad, 1), lambda i: (0, 0)),         # b1: resident
                pl.BlockSpec((1, h_pad), lambda i: (0, 0)),         # W2 row: resident
                pl.BlockSpec(memory_space=pltpu.MemorySpace.SMEM),  # b2: SMEM scalar
            ],
            out_specs=pl.BlockSpec((1, tile_b), lambda i: (0, i)),  # lane-dense output
        ),
        compiler_params=pltpu.CompilerParams(
            dimension_semantics=("parallel",),
            vmem_limit_bytes=_VMEM_LIMIT,
        ),
    )(x2, w1t, b1c, w2r, b2s)

    # Per-example log-probability of improvement: shape [B].
    return out[0]


def _reference(x, w1, b1, w2, b2):
    x2 = _squeeze(x).astype(jnp.float32)
    h = jnp.tanh(jnp.dot(x2, w1, precision=jax.lax.Precision.HIGHEST) + b1)
    z = jnp.dot(h, w2, precision=jax.lax.Precision.HIGHEST) + b2
    return jax.nn.log_sigmoid(z)[:, 0]


if __name__ == "__main__":
    key = jax.random.PRNGKey(0)
    k_x, k_w1, k_b1, k_w2, k_b2 = jax.random.split(key, 5)

    B, D, H = 512, 32, 32

    # Input with a singleton dim to exercise _squeeze: [B, 1, D]
    x = jax.random.normal(k_x, (B, 1, D), dtype=jnp.float32)

    # Deterministic synthetic parameters of the 2-layer classifier.
    w1 = 0.1 * jax.random.normal(k_w1, (D, H), dtype=jnp.float32)
    b1 = 0.01 * jax.random.normal(k_b1, (1, H), dtype=jnp.float32)
    w2 = 0.1 * jax.random.normal(k_w2, (H, 1), dtype=jnp.float32)
    b2 = 0.01 * jax.random.normal(k_b2, (1, 1), dtype=jnp.float32)

    # tile_b=128 -> grid of 4 steps, exercising the batch-tiled pipeline.
    out = logpi_classifier_acquisition(x, w1, b1, w2, b2, tile_b=128)
    out = jax.block_until_ready(out)

    ref = _reference(x, w1, b1, w2, b2)
    assert out.shape == (B,), out.shape
    assert jnp.allclose(out, ref, atol=5e-4, rtol=5e-4), (out, ref)

    print("KERNEL_OK")
</pallas_src>

<mosaic_0001>
module attributes {stable_mosaic.version = 11 : i64} {
  func.func @_logpi_kernel(%arg0: i32, %arg1: memref<128x32xf32, #tpu.memory_space<vmem>>, %arg2: memref<32x32xf32, #tpu.memory_space<vmem>>, %arg3: memref<32x1xf32, #tpu.memory_space<vmem>>, %arg4: memref<1x32xf32, #tpu.memory_space<vmem>>, %arg5: memref<1xf32, #tpu.memory_space<smem>>, %arg6: memref<1x128xf32, #tpu.memory_space<vmem>>) attributes {dimension_semantics = [#tpu.dimension_semantics<parallel>], iteration_bounds = array<i64: 4>, scalar_prefetch = 0 : i64, scratch_operands = 0 : i64, tpu.core_type = #tpu.core_type<tc>, window_params = [{transform_indices = @transform_0, window_bounds = array<i64: 128, 32>}, {pipeline_mode = #tpu.pipeline_mode<synchronous>, transform_indices = @transform_1, window_bounds = array<i64: 32, 32>}, {pipeline_mode = #tpu.pipeline_mode<synchronous>, transform_indices = @transform_2, window_bounds = array<i64: 32, 1>}, {pipeline_mode = #tpu.pipeline_mode<synchronous>, transform_indices = @transform_3, window_bounds = array<i64: 1, 32>}, {transform_indices = @transform_4, window_bounds = array<i64: 1>}, {transform_indices = @transform_5, window_bounds = array<i64: 1, 128>}]} {
    %c0 = arith.constant 0 : index
    %c0_0 = arith.constant 0 : index
    %0 = vector.load %arg2[%c0, %c0_0] : memref<32x32xf32, #tpu.memory_space<vmem>>, vector<32x32xf32>
    %c0_1 = arith.constant 0 : index
    %c0_2 = arith.constant 0 : index
    %1 = vector.load %arg1[%c0_1, %c0_2] : memref<128x32xf32, #tpu.memory_space<vmem>>, vector<128x32xf32>
    %cst = arith.constant dense<0.000000e+00> : vector<32x128xf32>
    %2 = tpu.matmul %0, %1, %cst {dimension_numbers = #tpu.dot_dimension_numbers<[1], [1], [0], [0], [0, 0, 1, 0], [], []>} : vector<32x32xf32>, vector<128x32xf32>, vector<32x128xf32> -> vector<32x128xf32>
    %c0_3 = arith.constant 0 : index
    %c0_4 = arith.constant 0 : index
    %3 = vector.load %arg3[%c0_3, %c0_4] : memref<32x1xf32, #tpu.memory_space<vmem>>, vector<32x1xf32>
    %4 = vector.broadcast %3 : vector<32x1xf32> to vector<32x128xf32>
    %5 = arith.addf %2, %4 : vector<32x128xf32>
    %6 = math.tanh %5 : vector<32x128xf32>
    %c0_5 = arith.constant 0 : index
    %c0_6 = arith.constant 0 : index
    %7 = vector.load %arg4[%c0_5, %c0_6] : memref<1x32xf32, #tpu.memory_space<vmem>>, vector<1x32xf32>
    %cst_7 = arith.constant dense<0.000000e+00> : vector<1x128xf32>
    %8 = tpu.matmul %7, %6, %cst_7 {dimension_numbers = #tpu.dot_dimension_numbers<[1], [0], [0], [1], [0, 0, 1, 1], [], []>} : vector<1x32xf32>, vector<32x128xf32>, vector<1x128xf32> -> vector<1x128xf32>
    %c0_8 = arith.constant 0 : index
    %9 = memref.load %arg5[%c0_8] : memref<1xf32, #tpu.memory_space<smem>>
    %10 = vector.broadcast %9 : f32 to vector<1x128xf32>
    %11 = arith.addf %8, %10 : vector<1x128xf32>
    %cst_9 = arith.constant 0.000000e+00 : f32
    %12 = vector.broadcast %cst_9 : f32 to vector<1x128xf32>
    %13 = arith.minimumf %11, %12 : vector<1x128xf32>
    %14 = math.absf %11 : vector<1x128xf32>
    %cst_10 = arith.constant 0.000000e+00 : f32
    %15 = vector.broadcast %cst_10 : f32 to vector<1x128xf32>
    %16 = arith.subf %15, %14 : vector<1x128xf32>
    %17 = math.exp %16 : vector<1x128xf32>
    %18 = math.log1p %17 : vector<1x128xf32>
    %19 = arith.subf %13, %18 : vector<1x128xf32>
    %c0_11 = arith.constant 0 : index
    %c0_12 = arith.constant 0 : index
    %20 = vector.load %arg6[%c0_11, %c0_12] : memref<1x128xf32, #tpu.memory_space<vmem>>, vector<1x128xf32>
    tpu.vector_store %arg6[%c0_11, %c0_12], %19 {strides = array<i32>} : memref<1x128xf32, #tpu.memory_space<vmem>>, vector<1x128xf32>,
    return
  }
  func.func @transform_0(%arg0: i32) -> (i32, i32) {
    %c0_i32 = arith.constant 0 : i32
    %c0_i32_0 = arith.constant 0 : i32
    return %arg0, %c0_i32 : i32, i32
  }
  func.func @transform_1(%arg0: i32) -> (i32, i32) {
    %c0_i32 = arith.constant 0 : i32
    %c0_i32_0 = arith.constant 0 : i32
    %c0_i32_1 = arith.constant 0 : i32
    return %c0_i32, %c0_i32_0 : i32, i32
  }
  func.func @transform_2(%arg0: i32) -> (i32, i32) {
    %c0_i32 = arith.constant 0 : i32
    %c0_i32_0 = arith.constant 0 : i32
    %c0_i32_1 = arith.constant 0 : i32
    return %c0_i32, %c0_i32_0 : i32, i32
  }
  func.func @transform_3(%arg0: i32) -> (i32, i32) {
    %c0_i32 = arith.constant 0 : i32
    %c0_i32_0 = arith.constant 0 : i32
    %c0_i32_1 = arith.constant 0 : i32
    return %c0_i32, %c0_i32_0 : i32, i32
  }
  func.func @transform_4(%arg0: i32) -> i32 {
    %c0_i32 = arith.constant 0 : i32
    %c0_i32_0 = arith.constant 0 : i32
    return %c0_i32 : i32
  }
  func.func @transform_5(%arg0: i32) -> (i32, i32) {
    %c0_i32 = arith.constant 0 : i32
    %c0_i32_0 = arith.constant 0 : i32
    return %c0_i32, %arg0 : i32, i32
  }
}

</mosaic_0001>

<bundles_post_ra>
// kernel: tpu_custom_call.1
= control target key start
LH: loop header
LB: loop body
LE: loop exit
PB: predicated region body
PF: predicated region fallthrough
CT: control target
= control target key end

     0   :  { %s1083_s0 = inlined_call_operand.vmem [shape: f32[512,32], index: 0, kind: input, shape index: {}]   ;;  %s1084_s1 = inlined_call_operand.vmem [shape: f32[32,32], index: 1, kind: input, shape index: {}]   ;;  %s1085_s2 = inlined_call_operand.vmem [shape: f32[32,1], index: 2, kind: input, shape index: {}]   ;;  %s1086_s3 = inlined_call_operand.vmem [shape: f32[1,32], index: 3, kind: input, shape index: {}]   ;;  %s1087_s4 = inlined_call_operand.<no memory space> [shape: f32[1], index: 4, kind: input, shape index: {}]   ;;  %s1088_s5 = inlined_call_operand.hbm [shape: f32[1,512], index: 5, kind: output, shape index: {}]  }
   0x1   :  { %10 = sst [smem:[#allocation2]] %s1087_s4 }
   0x2   :  { %11 = vsyncpa [#allocation4], 0 }
   0x3   :  { %13 = vsyncpa [#allocation4 + $0x1], 0  ;;  %s896_s20 = smov 0   ;;  %s898_s21 = smov 0  }
   0x4   :  { %s900_s22 = smov 0   ;;  %s902_s23 = smov 0  }
   0x5 LB: > { %s578_s4 = sadd.s32 4294967295, %s856_s23   ;;  %s579_s24 = sadd.s32 4294967294, %s856_s23   ;;  %s856_s23 = sphi %s902_s23, %s1096_s23   ;;  %s852_s22 = sphi %s900_s22, %s1095_s22   ;;  %s848_s21 = sphi %s898_s21, %s1094_s21   ;;  %s844_s20 = sphi %s896_s20, %s1093_s20  }
   0x6   : > { %s919_s25 = sadd.s32 1, %s856_s23   ;;  %s136_s26 = sadd.s32 1, %s852_s22 }
   0x7   : > { %s133_s27 = ssub.s32 %s856_s23, %s919_s25  ;;  %p146_p0 = scmp.ne.s32.totalorder %s852_s22, %s848_s21 }
   0x8   : > { %p134_p1 = scmp.eq.s32.totalorder %s133_s27, 0  ;;  %p147_p2 = scmp.eq.s32.totalorder %s578_s4, 3 }
   0x9   : > { %p152_p3 = scmp.ne.s32.totalorder %s848_s21, %s844_s20  ;;  %p153_p4 = scmp.eq.s32.totalorder %s579_s24, 3 }
   0xa   : > { %s929_s28 = scalar_select %p134_p1, %s852_s22, %s136_s26  }
   0xb   : > { %p931_p5 = por %p147_p2, %p146_p0  ;;  %p935_p6 = por %p153_p4, %p152_p3 }
   0xc   : > { %p582_p7 = scmp.ge.s32.totalorder %s856_s23, 1  ;;  %p192_p8 = scmp.lt.s32.totalorder %s856_s23, 5 }
   0xe   : > { %p193_p9 = pnand %p582_p7, %p192_p8 }
   0xf   : > { %s941_s6 = sshll.u32 (!%p193_p9), %s578_s4, 4  ;;  %vm269_vm0 = vcmask (!%p193_p9), 261120   ;;  %v225_v0 = vld [vmem:[%s1084_s1] sm:$0xff] (!%p193_p9)  ;;  %v858_v1 = vmov (!%p193_p9), 0   ;;  %v247_v3 = vld [vmem:[%s1085_s2 + $0x10] sm:$0xff] (!%p193_p9)  ;;  %v246_v4 = vld [vmem:[%s1085_s2 + $0x8] sm:$0xff] (!%p193_p9) }
  0x10   : > { %196 = sbr.rel (%p193_p9) target bundleno = 592 (0x250), region = 40  ;;  %p220_p10 = scmp.lt.s32.totalorder (!%p193_p9), %s941_s6, 63  ;;  %666 = vmatprep.mubr.msk.f32.mxu0 (!%p193_p9), %vm269_vm0, %v225_v0  ;;  %780 = vset.pattern.permute.xlu0 (!%p193_p9), %v858_v1  ;;  %v245_v2 = vld [vmem:[%s1085_s2] sm:$0xff] (!%p193_p9)  ;;  %v248_v5 = vld [vmem:[%s1085_s2 + $0x18] sm:$0xff] (!%p193_p9)  ;;  %vm968_vm1 = vmpackc.low (!%p193_p9), %vm269_vm0, %vm269_vm0  ;;  %v859_v34 = vmov (!%p193_p9), 0.0|0.0   ;;  %vm860_vm2 = vmmov (!%p193_p9), 0  }
  0x11   : > { %251 = vperm.xlu0 (!%p193_p9), %780, %v245_v2   ;;  %781 = vset.pattern.permute.xlu1 (!%p193_p9), %v858_v1  ;;  %v226_v31 = vld [vmem:[%s1084_s1 + $0x8] sm:$0xff] (!%p193_p9)  ;;  %v227_v32 = vld [vmem:[%s1084_s1 + $0x10] sm:$0xff] (!%p193_p9)  ;;  %v228_v33 = vld [vmem:[%s1084_s1 + $0x18] sm:$0xff] (!%p193_p9)  ;;  %v861_v35 = vmov (!%p193_p9), 0.0   ;;  %s217_s14 = sand.u32 (!%p193_p9), 1, %s848_s21   ;;  %s1041_s19 = scalar_lea.hbm (!%p193_p9), %s1088_s5, %s941_s6 }
  0x12   : > { %261 = vperm.xlu1 (!%p193_p9), %781, %v247_v3   ;;  %731 = vmatprep.subr.bf16.mxu1 (!%p193_p9), %v859_v34  ;;  %v419_v54 = vld [vmem:[%s1086_s3] sm:$0x1] (!%p193_p9)  ;;  %s218_s15 = scalar_lea.vmem (!%p193_p9), [#allocation3], %s217_s14  ;;  %s512_s4 = scalar_lea.sflag (!%p193_p9), [#allocation4], %s217_s14 }
  0x13   : > { %680 = vmatprep.mubr.msk.f32.mxu1 (!%p193_p9), %vm860_vm2, %v861_v35  ;;  %s524_s16 = sshll.u32 (!%p193_p9), %s218_s15, 4  ;;  %s862_s26 = smov (!%p193_p9), [#allocation3]   ;;  %s1043_s16 = int_to_ptr.vmem [resolvable:$true] %s524_s16 }
  0x14   : > { %s798_s27 = sshll.u32 (!%p193_p9), %s862_s26, 4  ;;  %s799_s27 = int_to_ptr.vmem [resolvable:$false] %s798_s27 }
  0x15   : > { %256 = vperm.xlu0 (!%p193_p9), %780, %v246_v4   ;;  %s800_s7 = scalar_lea.vmem (!%p193_p9), %s799_s27, 32  ;;  %p801_p0 = scmp.lt.s32.totalorder (!%p193_p9), %s1043_s16, %s799_s27 }
  0x16   : > { %266 = vperm.xlu1 (!%p193_p9), %781, %v248_v5  }
  0x17   : > { %s221_s13 = scalar_select %p220_p10, %s941_s6, 63 }
  0x19   : > { %s584_s18 = sshll.u32 %s221_s13, 3  ;;  %s420_s13 = sld [smem:[#allocation2]] }
  0x1a   : > { %s964_s24 = scalar_lea.vmem %s1083_s0, %s584_s18 }
  0x1b   : > { %v229_v7 = vld [vmem:[%s964_s24] sm:$0xff]  ;;  %v230_v8 = vld [vmem:[%s964_s24 + $0x8] sm:$0xff]  ;;  %v231_v9 = vld [vmem:[%s964_s24 + $0x10] sm:$0xff] }
  0x1c   : > { %v683_v10 = vpack.c.bf16 %v230_v8, %v229_v7  ;;  %v232_v11 = vld [vmem:[%s964_s24 + $0x18] sm:$0xff]  ;;  %v233_v13 = vld [vmem:[%s964_s24 + $0x20] sm:$0xff]  ;;  %v234_v14 = vld [vmem:[%s964_s24 + $0x28] sm:$0xff] }
  0x1d   : > { %v689_v12 = vpack.c.bf16 %v232_v11, %v231_v9  ;;  %v695_v15 = vpack.c.bf16 %v234_v14, %v233_v13  ;;  %v235_v16 = vld [vmem:[%s964_s24 + $0x30] sm:$0xff]  ;;  %v236_v17 = vld [vmem:[%s964_s24 + $0x38] sm:$0xff]  ;;  %v237_v19 = vld [vmem:[%s964_s24 + $0x40] sm:$0xff] }
  0x1e   : > { %685 = vmatprep.subr.msk.bf16.mxu0 %vm968_vm1, %v683_v10  ;;  %v701_v18 = vpack.c.bf16 %v236_v17, %v235_v16  ;;  %v238_v20 = vld [vmem:[%s964_s24 + $0x48] sm:$0xff]  ;;  %v239_v22 = vld [vmem:[%s964_s24 + $0x50] sm:$0xff]  ;;  %v240_v23 = vld [vmem:[%s964_s24 + $0x58] sm:$0xff] }
  0x1f   : > { %688 = vmatpush3.bf16.xpose.msk.msra.mxu0 %vm968_vm1, %v683_v10  ;;  %v707_v21 = vpack.c.bf16 %v238_v20, %v237_v19  ;;  %v713_v24 = vpack.c.bf16 %v240_v23, %v239_v22  ;;  %v241_v25 = vld [vmem:[%s964_s24 + $0x60] sm:$0xff]  ;;  %v242_v26 = vld [vmem:[%s964_s24 + $0x68] sm:$0xff]  ;;  %v243_v28 = vld [vmem:[%s964_s24 + $0x70] sm:$0xff]  ;;  %v421_v55 = vstv %s420_s13 }
  0x20   : > { %691 = vmatprep.subr.msk.bf16.mxu0 %vm968_vm1, %v689_v12  ;;  %v719_v27 = vpack.c.bf16 %v242_v26, %v241_v25  ;;  %v244_v29 = vld [vmem:[%s964_s24 + $0x78] sm:$0xff]  ;;  %s794_s24 = scalar_lea.vmem %s1043_s16, 16 }
  0x21   : > { %v725_v30 = vpack.c.bf16 %v244_v29, %v243_v28  ;;  %p795_p11 = scmp.ne.s32.totalorder %s1043_s16, %s794_s24  ;;  %p802_p1 = scmp.lt.s32.totalorder %s800_s7, %s794_s24 }
  0x23   : > { %p796_p12 = pnand %p795_p11, %p931_p5  ;;  %p803_p2 = por %p802_p1, %p801_p0 }
  0x25   : > { %p797_p13 = pneg %p796_p12 }
  0x27   : > { %694 = vmatpush3.bf16.xpose.msk.msra.mxu0 %vm968_vm1, %v689_v12  ;;  %p804_p3 = pnand %p803_p2, %p797_p13 }
  0x28   : > { %697 = vmatprep.subr.msk.bf16.mxu0 %vm968_vm1, %v695_v15 }
  0x2f   : > { %700 = vmatpush3.bf16.xpose.msk.msra.mxu0 %vm968_vm1, %v695_v15 }
  0x30   : > { %703 = vmatprep.subr.msk.bf16.mxu0 %vm968_vm1, %v701_v18 }
  0x37   : > { %706 = vmatpush3.bf16.xpose.msk.msra.mxu0 %vm968_vm1, %v701_v18 }
  0x38   : > { %709 = vmatprep.subr.msk.bf16.mxu0 %vm968_vm1, %v707_v21 }
  0x3f   : > { %712 = vmatpush3.bf16.xpose.msk.msra.mxu0 %vm968_vm1, %v707_v21 }
  0x40   : > { %715 = vmatprep.subr.msk.bf16.mxu0 %vm968_vm1, %v713_v24 }
  0x47   : > { %718 = vmatpush3.bf16.xpose.msk.msra.mxu0 %vm968_vm1, %v713_v24 }
  0x48   : > { %721 = vmatprep.subr.msk.bf16.mxu0 %vm968_vm1, %v719_v27 }
  0x4f   : > { %724 = vmatpush3.bf16.xpose.msk.msra.mxu0 %vm968_vm1, %v719_v27 }
  0x50   : > { %727 = vmatprep.subr.msk.bf16.mxu0 %vm968_vm1, %v725_v30 }
  0x57   : > { %730 = vmatpush3.bf16.xpose.msk.msra.mxu0 %vm968_vm1, %v725_v30 }
  0x5e   : > { %667 = vmatmul.mubr.msk.f32.vlgmr.msra.gmra.mrb[0].mxu0 %vm269_vm0, %v226_v31 }
  0x5f   : > { %669 = vmatprep.mubr.msk.f32.mxu0 %vm269_vm0, %v227_v32 }
  0x62   : > { %670 = vmatmul.mubr.msk.f32.gmra.mrb[2].mxu0 %vm269_vm0, %v228_v33 }
  0x90   : > { %v252_v36 = vpop.permute.xlu0 %251 }
  0x91   : > { %v262_v37 = vpop.permute.xlu1 %261 }
  0x94   : > { %v257_v38 = vpop.permute.xlu0 %256 }
  0x95   : > { %v267_v43 = vpop.permute.xlu1 %266 }
 0x131   : > { %v668_v39 = vpop.f32.mrb[0].mxu0 }
 0x132   : > { %v402_v40 = vadd.f32 %v668_v39, %v257_v38  ;;  %v396_v41 = vpop.f32.mrb[1].mxu0 }
 0x133   : > { %v397_v42 = vadd.f32 %v396_v41, %v252_v36 }
 0x134   : > { %782 = vtanh.f32 %v402_v40 }
 0x135   : > { %784 = vtanh.f32 %v397_v42  ;;  %v671_v44 = vpop.f32.mrb[2].mxu0 }
 0x136   : > { %v412_v45 = vadd.f32 %v671_v44, %v267_v43  ;;  %v406_v46 = vpop.f32.mrb[3].mxu0 }
 0x137   : > { %v407_v47 = vadd.f32 %v406_v46, %v262_v37 }
 0x138   : > { %786 = vtanh.f32 %v412_v45 }
 0x139   : > { %788 = vtanh.f32 %v407_v47 }
 0x13e   : > { %v783_v48 = vpop.eup %782 }
 0x13f   : > { %v785_v49 = vpop.eup %784 }
 0x140   : > { %v732_v50 = vpack.c.bf16 %v783_v48, %v785_v49 }
 0x142   : > { %v787_v51 = vpop.eup %786  ;;  %733 = vmatpush3.bf16.msra.mxu1 %v732_v50 }
 0x143   : > { %v789_v52 = vpop.eup %788  ;;  %734 = vmatprep.subr.bf16.mxu1 %v859_v34 }
 0x144   : > { %v735_v53 = vpack.c.bf16 %v787_v51, %v789_v52 }
 0x146   : > { %736 = vmatpush3.bf16.msra.mxu1 %v735_v53 }
 0x149   : > { %681 = vmatmul.mubr.msk.f32.vlgmr.msra.gmra.mrb[0].mxu1 %vm269_vm0, %v419_v54 }
 0x21c   : > { %v491_v56 = vpop.f32.mrb[0].mxu1 }
 0x21d   : > { %v492_v57 = vadd.f32 %v491_v56, %v421_v55  ;;  %v682_v58 = vpop.f32.mrb[1].mxu1 }
 0x21f   : > { %v496_v59 = vand.u32 2147483647, %v492_v57  ;;  %v495_v6 = vmin.f32 %v492_v57, 0.0 }
 0x221   : > { %v497_v60 = vsub.f32 0.0, %v496_v59 }
 0x223   : > { %v498_v61 = vmul.f32 1.442695, %v497_v60 }
 0x225   : > { %790 = vpow2.f32 %v498_v61 }
 0x22f   : > { %v791_v62 = vpop.eup %790 }
 0x230   : > { %v500_v63 = vadd.f32 1.0, %v791_v62  ;;  %v503_v0 = vmul.f32 -0.5, %v791_v62  ;;  %v506_v2 = vand.u32 2147483647, %v791_v62 }
 0x232   : > { %792 = vlog2.f32 %v500_v63  ;;  %v504_v1 = vadd.f32 1.0, %v503_v0  ;;  %vm507_vm3 = vcmp.lt.f32.partialorder %v506_v2, 0.0004427343 }
 0x234   : > { %v505_v5 = vmul.f32 %v791_v62, %v504_v1 }
 0x23c   : > { %v793_v3 = vpop.eup %792 }
 0x23d   : > { %v502_v4 = vmul.f32 0.6931472, %v793_v3 }
 0x23f   : > { %v508_v7 = vsel %vm507_vm3, %v505_v5, %v502_v4 }
 0x240   : > { %v509_v8 = vsub.f32 %v495_v6, %v508_v7 }
 0x242   : > { %510 = vst [vmem:[%s218_s15] sm:$0x1] %v509_v8 }
 0x243   : > { %807 = shalt.err (!%p804_p3)
}
 0x244   : > { %s808_s6 = scalar_lea.hbm %s1041_s19, 16  ;;  %s812_s10 = scalar_lea.hbm %s1088_s5, 64 }
 0x245   : > { %p809_p4 = scmp.ne.s32.totalorder %s1041_s19, %s808_s6  ;;  %p813_p9 = scmp.lt.u32.totalorder %s1041_s19, %s1088_s5 }
 0x246   : > { %p814_p10 = scmp.lt.u32.totalorder %s812_s10, %s808_s6  ;;  %p816_p12 = scmp.lt.u32.totalorder %s808_s6, %s1041_s19 }
 0x247   : > { %p810_p7 = pnand %p809_p4, %p931_p5 }
 0x248   : > { %p815_p11 = por %p814_p10, %p813_p9 }
 0x249   : > { %p811_p8 = pneg %p810_p7 }
 0x24a   : > { %p817_p13 = por %p816_p12, %p815_p11 }
 0x24c   : > { %p818_p0 = pnand %p817_p13, %p811_p8 }
 0x24e   : > { %821 = shalt.err (!%p818_p0)
}
 0x24f   : > { %737 = dma.vmem_to_hbm [thread:$0]  (%p931_p5), %s1043_s16, 16, %s1041_s19, %s512_s4  }
 0x250 PF: > { %p743_p1 = scmp.ge.s32.totalorder %s856_s23, 2  ;;  %s536_s13 = sand.u32 1, %s844_s20  }
 0x251   : > { %s537_s14 = scalar_lea.sflag [#allocation4], %s536_s13 }
 0x252   : > { %p740_p2 = pnand %p743_p1, %p935_p6 }
 0x254   : > { %839 = dma.done.wait (!%p740_p2), %s537_s14, 16  }
 0x255   : > { %841 = vsyncadd (!%p740_p2), %s537_s14, 4294967280  ;;  %p16_p3 = scmp.ge.s32.totalorder %s919_s25, 6   ;;  %s1093_s20 = smov %s848_s21 }
 0x256   : > { %s1094_s21 = smov %s852_s22  ;;  %s1095_s22 = smov %s929_s28 }
 0x257   : > { %s1096_s23 = smov %s919_s25  ;;  %18 = sbr.rel (!%p16_p3) target bundleno = 5 (0x5), region = 75 }
 0x25e   :  { %541 = vsyncpa [#allocation4], 1 }
 0x25f   :  { %543 = vsyncpa [#allocation4 + $0x1], 1 }

</bundles_post_ra>
